<compile_context>
chip_gen: v5e
topology: v5e:2x2
jax: 0.10.0
libtpu: 0.0.40
codegen_flags: <defaults>
</compile_context>

<pallas_src>
import jax
import jax.numpy as jnp
from jax import lax
from jax.experimental import pallas as pl
from jax.experimental.pallas import tpu as pltpu

_SELU_ALPHA = 1.6732632423543772848170429916717
_SELU_SCALE = 1.0507009873554804934193349852946


def _round_up(x, m):
    return (x + m - 1) // m * m


def _make_kernel(n_nodes, tile_n, compute_dtype):
    def kernel(nodes_ref, gid_ref, w_ref, b_ref, out_ref):
        i = pl.program_id(1)  # node-tile index (reduction axis)

        @pl.when(i == 0)
        def _init():
            out_ref[...] = jnp.zeros_like(out_ref)

        # ---- Linear: bf16 operands on the MXU, f32 accumulation ----
        x = nodes_ref[...].astype(compute_dtype)                    # (TN, H)
        y = jnp.dot(x, w_ref[...], preferred_element_type=jnp.float32) + b_ref[...]

        # Mask rows past the true node count BEFORE exp: the last node tile
        # may carry garbage HBM rows (nodes are not pre-padded on the host);
        # exp(garbage) could be inf and inf*0 in the one-hot matmul -> NaN.
        row = i * tile_n + lax.broadcasted_iota(jnp.int32, (y.shape[0], 1), 0)
        y = jnp.where(row < n_nodes, y, 0.0)

        # SELU in f32 (exp runs on the EUP).
        act = _SELU_SCALE * jnp.where(y > 0.0, y, _SELU_ALPHA * (jnp.exp(y) - 1.0))

        # ---- Segment-sum via lane-dense *transposed* one-hot ----
        # gid is a (1, TN) row; 0/1 is exact in bf16; accumulation stays f32
        # in the resident output block. Padded gid/node columns contribute 0.
        gid = gid_ref[...]                                           # (1, TN) int32
        row_ids = lax.broadcasted_iota(
            jnp.int32, (out_ref.shape[0], gid.shape[1]), 0)
        one_hot_t = (row_ids == gid).astype(compute_dtype)           # (Bp, TN)
        out_ref[...] += jnp.dot(one_hot_t, act.astype(compute_dtype),
                                preferred_element_type=jnp.float32)

        @pl.when(i == pl.num_programs(1) - 1)
        def _finalize():
            out_ref[...] = jnp.tanh(out_ref[...])

    return kernel


def aggregate_readout(nodes, graph_id, weight, bias, batchsize, *,
                      tile_nodes=None, feature_blocks=None,
                      compute_dtype=jnp.bfloat16):
    """Forward pass of AggregateReadout.

    nodes:     (N, H) float node embeddings.
    graph_id:  (N,)   int, maps each node to its graph in the batch.
    weight:    (H, H) stored so that y = x @ weight + bias
               (i.e. the transpose of the PyTorch nn.Linear .weight).
    bias:      (H,)
    batchsize: static int = max(graph_id) + 1.
    """
    n, h = nodes.shape
    batchsize = int(batchsize)
    b_pad = _round_up(max(batchsize, 1), 8)

    compute_dtype = jnp.dtype(compute_dtype)
    cd_bytes = compute_dtype.itemsize
    in_bytes = jnp.dtype(nodes.dtype).itemsize

    # ---- Node-tile sizing: large tiles amortize the ~0.35us per-grid-step
    # overhead; keep the in-flight footprint around ~24 MiB so it fits v7x's
    # 64 MiB VMEM as well as v5e/v6e's 128 MiB. ----
    if tile_nodes is None:
        tile_nodes = (24 * 1024 * 1024) // (20 * max(h, 1) + 64)
        tile_nodes = max(256, min(4096, (tile_nodes // 128) * 128))
    if n <= tile_nodes:
        tn, num_tiles = n, 1
    else:
        tn = min(_round_up(tile_nodes, 128), _round_up(n, 128))
        if tn >= n:
            tn, num_tiles = n, 1
        else:
            num_tiles = pl.cdiv(n, tn)

    # ---- Optional output-feature split: 2 column blocks on v7x so both
    # TensorCores get work ("parallel" axis); neutral/off elsewhere. ----
    if feature_blocks is None:
        feature_blocks = 1
        if h >= 256 and h % 256 == 0:
            try:
                kind = jax.devices()[0].device_kind.lower()
                if "v7" in kind or "7x" in kind:
                    feature_blocks = 2
            except Exception:
                pass
    ncol = int(feature_blocks)
    assert h % ncol == 0, "feature_blocks must divide n_hidden"
    h_col = h // ncol
    assert ncol == 1 or h_col % 128 == 0, "column blocks must be 128-lane aligned"

    # ---- Host-side prep: NO re-pack of the big node matrix. Only the tiny
    # weight/bias/graph_id arrays are cast / reshaped. ----
    w_c = weight.astype(compute_dtype)                  # (H, H)
    b_2d = bias.reshape(1, h).astype(jnp.float32)       # (1, H)
    gid_2d = graph_id.reshape(1, n).astype(jnp.int32)   # (1, N), lane-dense

    # ---- VMEM budget: generation-aware cap, never below the real need. ----
    vmem_need = (
        2 * tn * h * in_bytes                        # double-buffered node tiles
        + 2 * tn * 4                                 # double-buffered gid tiles
        + 2 * (h * h_col * cd_bytes + h_col * 4)     # weight/bias (<=2 buffers)
        + 2 * b_pad * h_col * 4                      # resident output block
        + tn * h * cd_bytes                          # x cast
        + tn * h_col * (8 + cd_bytes)                # y, act, act cast
        + b_pad * tn * (4 + cd_bytes)                # row-id iota + one-hot
        + tn * 8                                     # tail-row mask
    )
    try:
        cap = int(pltpu.get_tpu_info().vmem_capacity_bytes)
    except Exception:
        cap = 64 * 1024 * 1024                       # conservative (v7x-sized)
    cap = max(cap - 8 * 1024 * 1024, 16 * 1024 * 1024)
    vmem_limit = int(min(max(int(1.5 * vmem_need), 32 * 1024 * 1024), cap))
    vmem_limit = int(max(vmem_limit, min(vmem_need + (1 << 20), cap)))

    kernel = _make_kernel(n, tn, compute_dtype)
    out_shape = jax.ShapeDtypeStruct((b_pad, h), jnp.float32)
    cost = pl.CostEstimate(
        flops=2 * n * h * h + 2 * n * b_pad * h + 8 * n * h,
        transcendentals=n * h + b_pad * h,
        bytes_accessed=n * h * in_bytes + h * h * cd_bytes + 4 * (n + h + b_pad * h),
    )

    def build(single_buffer_params):
        extra = dict(pipeline_mode=pl.Buffered(1)) if single_buffer_params else {}
        return pl.pallas_call(
            kernel,
            out_shape=out_shape,
            grid_spec=pltpu.PrefetchScalarGridSpec(
                num_scalar_prefetch=0,
                grid=(ncol, num_tiles),
                in_specs=[
                    # nodes stream, pipelined over the reduction axis.
                    # (If the DMA is still exposed at small H, this is the spec
                    # to bump to pipeline_mode=pl.Buffered(3).)
                    pl.BlockSpec((tn, h), lambda j, i: (i, 0)),
                    # graph ids, lane-dense (1, TN) row.
                    pl.BlockSpec((1, tn), lambda j, i: (0, i)),
                    # weight / bias: (near-)constant block index -> single
                    # VMEM buffer, no per-tile re-DMA.
                    pl.BlockSpec((h, h_col), lambda j, i: (0, j), **extra),
                    pl.BlockSpec((1, h_col), lambda j, i: (0, j), **extra),
                ],
                # Resident f32 accumulator block; tanh applied in place on the
                # last node tile (no scratch accumulator).
                out_specs=pl.BlockSpec((b_pad, h_col), lambda j, i: (0, j)),
            ),
            compiler_params=pltpu.CompilerParams(
                dimension_semantics=("parallel", "arbitrary"),
                vmem_limit_bytes=vmem_limit,
            ),
            cost_estimate=cost,
        )

    try:
        out = build(True)(nodes, gid_2d, w_c, b_2d)
    except Exception:
        # Fallback if this JAX build rejects single-buffered (Buffered(1)) specs.
        out = build(False)(nodes, gid_2d, w_c, b_2d)

    return out[:batchsize, :].astype(nodes.dtype)


# ------------------------- references & self-test -------------------------

def _reference(nodes, graph_id, weight, bias, batchsize):
    y = nodes.astype(jnp.float32) @ weight.astype(jnp.float32) + bias.astype(jnp.float32)
    act = _SELU_SCALE * jnp.where(y > 0, y, _SELU_ALPHA * (jnp.exp(y) - 1.0))
    gsum = jnp.zeros((batchsize, nodes.shape[1]), jnp.float32).at[graph_id].add(act)
    return jnp.tanh(gsum)


def _reference_mixed(nodes, graph_id, weight, bias, batchsize):
    # Same math with the kernel's bf16 casts (f32 accumulation): checks kernel
    # mechanics independently of bf16-vs-f32 drift.
    x = nodes.astype(jnp.bfloat16)
    w = weight.astype(jnp.bfloat16)
    y = jnp.dot(x, w, preferred_element_type=jnp.float32) + bias.astype(jnp.float32)
    act = _SELU_SCALE * jnp.where(y > 0, y, _SELU_ALPHA * (jnp.exp(y) - 1.0))
    act = act.astype(jnp.bfloat16).astype(jnp.float32)
    gsum = jnp.zeros((batchsize, nodes.shape[1]), jnp.float32).at[graph_id].add(act)
    return jnp.tanh(gsum)


if __name__ == "__main__":
    key = jax.random.PRNGKey(0)
    (k_nodes, k_w, k_b, k_gid2, k_nodes2,
     k_nodes3, k_gid3, k_w3, k_b3) = jax.random.split(key, 9)

    # --- Case 1: canonical small case (single node tile) ---
    n_hidden, n_nodes = 32, 8
    nodes = jax.random.normal(k_nodes, (n_nodes, n_hidden), dtype=jnp.float32)
    w_torch = (jax.random.normal(k_w, (n_hidden, n_hidden), dtype=jnp.float32)
               / jnp.sqrt(jnp.float32(n_hidden)))       # nn.Linear .weight layout
    weight = w_torch.T                                   # y = x @ weight + bias
    bias = jax.random.normal(k_b, (n_hidden,), dtype=jnp.float32) * 0.1
    graph_id = jnp.array([0, 0, 0, 1, 1, 1, 2, 2], dtype=jnp.int32)
    batchsize = int(jax.device_get(graph_id.max())) + 1

    ref = _reference(nodes, graph_id, weight, bias, batchsize)

    out_f32 = jax.block_until_ready(
        aggregate_readout(nodes, graph_id, weight, bias, batchsize,
                          compute_dtype=jnp.float32))
    assert out_f32.shape == (batchsize, n_hidden)
    assert jnp.allclose(out_f32, ref, atol=1e-5, rtol=1e-5)

    out_bf16 = jax.block_until_ready(
        aggregate_readout(nodes, graph_id, weight, bias, batchsize))
    assert jnp.allclose(out_bf16,
                        _reference_mixed(nodes, graph_id, weight, bias, batchsize),
                        atol=2e-3, rtol=2e-3)
    assert jnp.allclose(out_bf16, ref, atol=5e-2, rtol=5e-2)

    # --- Case 2: multi-tile node grid (resident accumulation + in-kernel
    # masking of the padded last node tile) ---
    n_nodes2 = 700
    nodes2 = jax.random.normal(k_nodes2, (n_nodes2, n_hidden), dtype=jnp.float32)
    graph_id2 = jnp.sort(jax.random.randint(k_gid2, (n_nodes2,), 0, 5)).astype(jnp.int32)
    batchsize2 = int(jax.device_get(graph_id2.max())) + 1

    ref2 = _reference(nodes2, graph_id2, weight, bias, batchsize2)
    out2_f32 = jax.block_until_ready(
        aggregate_readout(nodes2, graph_id2, weight, bias, batchsize2,
                          tile_nodes=256, compute_dtype=jnp.float32))
    assert out2_f32.shape == (batchsize2, n_hidden)
    assert jnp.allclose(out2_f32, ref2, atol=1e-4, rtol=1e-4)

    out2_bf16 = jax.block_until_ready(
        aggregate_readout(nodes2, graph_id2, weight, bias, batchsize2,
                          tile_nodes=256))
    assert jnp.allclose(out2_bf16,
                        _reference_mixed(nodes2, graph_id2, weight, bias, batchsize2),
                        atol=5e-3, rtol=5e-3)

    # --- Case 3: wider hidden dim with an explicit output-feature split
    # (the v7x two-TensorCore path; runs correctly on any chip) ---
    n_hidden3, n_nodes3 = 256, 64
    nodes3 = jax.random.normal(k_nodes3, (n_nodes3, n_hidden3), dtype=jnp.float32)
    weight3 = (jax.random.normal(k_w3, (n_hidden3, n_hidden3), dtype=jnp.float32)
               / jnp.sqrt(jnp.float32(n_hidden3))).T
    bias3 = jax.random.normal(k_b3, (n_hidden3,), dtype=jnp.float32) * 0.1
    graph_id3 = jnp.sort(jax.random.randint(k_gid3, (n_nodes3,), 0, 4)).astype(jnp.int32)
    batchsize3 = int(jax.device_get(graph_id3.max())) + 1

    ref3 = _reference(nodes3, graph_id3, weight3, bias3, batchsize3)
    out3 = jax.block_until_ready(
        aggregate_readout(nodes3, graph_id3, weight3, bias3, batchsize3,
                          feature_blocks=2, compute_dtype=jnp.float32))
    assert out3.shape == (batchsize3, n_hidden3)
    assert jnp.allclose(out3, ref3, atol=1e-4, rtol=1e-4)

    print("KERNEL_OK")
</pallas_src>

<mosaic_0001>
module attributes {stable_mosaic.version = 11 : i64} {
  func.func @kernel(%arg0: i32, %arg1: i32, %arg2: memref<8x32xf32, #tpu.memory_space<vmem>>, %arg3: memref<1x8xi32, #tpu.memory_space<vmem>>, %arg4: memref<32x32xf32, #tpu.memory_space<vmem>>, %arg5: memref<1x32xf32, #tpu.memory_space<vmem>>, %arg6: memref<8x32xf32, #tpu.memory_space<vmem>>) attributes {dimension_semantics = [#tpu.dimension_semantics<parallel>, #tpu.dimension_semantics<arbitrary>], iteration_bounds = array<i64: 1, 1>, scalar_prefetch = 0 : i64, scratch_operands = 0 : i64, tpu.core_type = #tpu.core_type<tc>, window_params = [{transform_indices = @transform_0, window_bounds = array<i64: 8, 32>}, {transform_indices = @transform_1, window_bounds = array<i64: 1, 8>}, {pipeline_mode = #tpu.pipeline_mode<synchronous>, transform_indices = @transform_2, window_bounds = array<i64: 32, 32>}, {pipeline_mode = #tpu.pipeline_mode<synchronous>, transform_indices = @transform_3, window_bounds = array<i64: 1, 32>}, {transform_indices = @transform_4, window_bounds = array<i64: 8, 32>}]} {
    %c0_i32 = arith.constant 0 : i32
    %0 = arith.cmpi eq, %arg1, %c0_i32 : i32
    %1 = arith.extui %0 : i1 to i32
    %c0_i32_0 = arith.constant 0 : i32
    %2 = arith.cmpi ne, %1, %c0_i32_0 : i32
    scf.if %2 {
      %cst_21 = arith.constant 0.000000e+00 : f32
      %42 = vector.broadcast %cst_21 : f32 to vector<8x32xf32>
      %c0_22 = arith.constant 0 : index
      %c0_23 = arith.constant 0 : index
      %43 = vector.load %arg6[%c0_22, %c0_23] : memref<8x32xf32, #tpu.memory_space<vmem>>, vector<8x32xf32>
      tpu.vector_store %arg6[%c0_22, %c0_23], %42 {strides = array<i32>} : memref<8x32xf32, #tpu.memory_space<vmem>>, vector<8x32xf32>,
    } else {
    }
    %c0 = arith.constant 0 : index
    %c0_1 = arith.constant 0 : index
    %3 = vector.load %arg2[%c0, %c0_1] : memref<8x32xf32, #tpu.memory_space<vmem>>, vector<8x32xf32>
    %c0_2 = arith.constant 0 : index
    %c0_3 = arith.constant 0 : index
    %4 = vector.load %arg4[%c0_2, %c0_3] : memref<32x32xf32, #tpu.memory_space<vmem>>, vector<32x32xf32>
    %cst = arith.constant dense<0.000000e+00> : vector<8x32xf32>
    %5 = tpu.matmul %3, %4, %cst {dimension_numbers = #tpu.dot_dimension_numbers<[1], [0], [0], [1], [0, 0, 1, 1], [], []>} : vector<8x32xf32>, vector<32x32xf32>, vector<8x32xf32> -> vector<8x32xf32>
    %c0_4 = arith.constant 0 : index
    %c0_5 = arith.constant 0 : index
    %6 = vector.load %arg5[%c0_4, %c0_5] : memref<1x32xf32, #tpu.memory_space<vmem>>, vector<1x32xf32>
    %7 = vector.broadcast %6 : vector<1x32xf32> to vector<8x32xf32>
    %8 = arith.addf %5, %7 : vector<8x32xf32>
    %c8_i32 = arith.constant 8 : i32
    %9 = arith.muli %arg1, %c8_i32 : i32
    %10 = tpu.iota {dimensions = array<i32: 0>} : vector<8x1xi32>
    %11 = vector.broadcast %9 : i32 to vector<8x1xi32>
    %12 = arith.addi %11, %10 : vector<8x1xi32>
    %c8_i32_6 = arith.constant 8 : i32
    %13 = vector.broadcast %c8_i32_6 : i32 to vector<8x1xi32>
    %14 = arith.cmpi slt, %12, %13 : vector<8x1xi32>
    %cst_7 = arith.constant 0.000000e+00 : f32
    %15 = vector.shape_cast %14 : vector<8x1xi1> to vector<8x1xi1>
    %16 = vector.broadcast %15 : vector<8x1xi1> to vector<8x32xi1>
    %17 = vector.broadcast %cst_7 : f32 to vector<8x32xf32>
    %18 = arith.select %16, %8, %17 : vector<8x32xi1>, vector<8x32xf32>
    %cst_8 = arith.constant 0.000000e+00 : f32
    %19 = vector.broadcast %cst_8 : f32 to vector<8x32xf32>
    %20 = arith.cmpf ogt, %18, %19 : vector<8x32xf32>
    %21 = math.exp %18 : vector<8x32xf32>
    %cst_9 = arith.constant 1.000000e+00 : f32
    %22 = vector.broadcast %cst_9 : f32 to vector<8x32xf32>
    %23 = arith.subf %21, %22 : vector<8x32xf32>
    %cst_10 = arith.constant 1.67326319 : f32
    %24 = vector.broadcast %cst_10 : f32 to vector<8x32xf32>
    %25 = arith.mulf %24, %23 : vector<8x32xf32>
    %26 = arith.select %20, %18, %25 : vector<8x32xi1>, vector<8x32xf32>
    %cst_11 = arith.constant 1.05070102 : f32
    %27 = vector.broadcast %cst_11 : f32 to vector<8x32xf32>
    %28 = arith.mulf %27, %26 : vector<8x32xf32>
    %c0_12 = arith.constant 0 : index
    %c0_13 = arith.constant 0 : index
    %29 = vector.load %arg3[%c0_12, %c0_13] : memref<1x8xi32, #tpu.memory_space<vmem>>, vector<1x8xi32>
    %30 = tpu.iota {dimensions = array<i32: 0>} : vector<8x8xi32>
    %31 = vector.broadcast %29 : vector<1x8xi32> to vector<8x8xi32>
    %32 = arith.cmpi eq, %30, %31 : vector<8x8xi32>
    %33 = arith.extui %32 : vector<8x8xi1> to vector<8x8xi32>
    %34 = arith.sitofp %33 : vector<8x8xi32> to vector<8x8xf32>
    %c0_14 = arith.constant 0 : index
    %c0_15 = arith.constant 0 : index
    %35 = vector.load %arg6[%c0_14, %c0_15] : memref<8x32xf32, #tpu.memory_space<vmem>>, vector<8x32xf32>
    %cst_16 = arith.constant dense<0.000000e+00> : vector<8x32xf32>
    %36 = tpu.matmul %34, %28, %cst_16 {dimension_numbers = #tpu.dot_dimension_numbers<[1], [0], [0], [1], [0, 0, 1, 1], [], []>} : vector<8x8xf32>, vector<8x32xf32>, vector<8x32xf32> -> vector<8x32xf32>
    %37 = arith.addf %35, %36 : vector<8x32xf32>
    %c0_17 = arith.constant 0 : index
    %c0_18 = arith.constant 0 : index
    %38 = vector.load %arg6[%c0_17, %c0_18] : memref<8x32xf32, #tpu.memory_space<vmem>>, vector<8x32xf32>
    tpu.vector_store %arg6[%c0_17, %c0_18], %37 {strides = array<i32>} : memref<8x32xf32, #tpu.memory_space<vmem>>, vector<8x32xf32>,
    %c0_i32_19 = arith.constant 0 : i32
    %39 = arith.cmpi eq, %arg1, %c0_i32_19 : i32
    %40 = arith.extui %39 : i1 to i32
    %c0_i32_20 = arith.constant 0 : i32
    %41 = arith.cmpi ne, %40, %c0_i32_20 : i32
    scf.if %41 {
      %c0_21 = arith.constant 0 : index
      %c0_22 = arith.constant 0 : index
      %42 = vector.load %arg6[%c0_21, %c0_22] : memref<8x32xf32, #tpu.memory_space<vmem>>, vector<8x32xf32>
      %43 = math.tanh %42 : vector<8x32xf32>
      %c0_23 = arith.constant 0 : index
      %c0_24 = arith.constant 0 : index
      %44 = vector.load %arg6[%c0_23, %c0_24] : memref<8x32xf32, #tpu.memory_space<vmem>>, vector<8x32xf32>
      tpu.vector_store %arg6[%c0_23, %c0_24], %43 {strides = array<i32>} : memref<8x32xf32, #tpu.memory_space<vmem>>, vector<8x32xf32>,
    } else {
    }
    return
  }
  func.func @transform_0(%arg0: i32, %arg1: i32) -> (i32, i32) {
    %c0_i32 = arith.constant 0 : i32
    %c0_i32_0 = arith.constant 0 : i32
    return %arg1, %c0_i32 : i32, i32
  }
  func.func @transform_1(%arg0: i32, %arg1: i32) -> (i32, i32) {
    %c0_i32 = arith.constant 0 : i32
    %c0_i32_0 = arith.constant 0 : i32
    return %c0_i32, %arg1 : i32, i32
  }
  func.func @transform_2(%arg0: i32, %arg1: i32) -> (i32, i32) {
    %c0_i32 = arith.constant 0 : i32
    %c0_i32_0 = arith.constant 0 : i32
    return %c0_i32, %arg0 : i32, i32
  }
  func.func @transform_3(%arg0: i32, %arg1: i32) -> (i32, i32) {
    %c0_i32 = arith.constant 0 : i32
    %c0_i32_0 = arith.constant 0 : i32
    return %c0_i32, %arg0 : i32, i32
  }
  func.func @transform_4(%arg0: i32, %arg1: i32) -> (i32, i32) {
    %c0_i32 = arith.constant 0 : i32
    %c0_i32_0 = arith.constant 0 : i32
    return %c0_i32, %arg0 : i32, i32
  }
}

module attributes {stable_mosaic.version = 11 : i64} {
  func.func @kernel(%arg0: i32, %arg1: i32, %arg2: memref<8x32xf32, #tpu.memory_space<vmem>>, %arg3: memref<1x8xi32, #tpu.memory_space<vmem>>, %arg4: memref<32x32xf32, #tpu.memory_space<vmem>>, %arg5: memref<1x32xf32, #tpu.memory_space<vmem>>, %arg6: memref<8x32xf32, #tpu.memory_space<vmem>>) attributes {dimension_semantics = [#tpu.dimension_semantics<parallel>, #tpu.dimension_semantics<arbitrary>], iteration_bounds = array<i64: 1, 1>, scalar_prefetch = 0 : i64, scratch_operands = 0 : i64, tpu.core_type = #tpu.core_type<tc>, window_params = [{transform_indices = @transform_0, window_bounds = array<i64: 8, 32>}, {transform_indices = @transform_1, window_bounds = array<i64: 1, 8>}, {transform_indices = @transform_2, window_bounds = array<i64: 32, 32>}, {transform_indices = @transform_3, window_bounds = array<i64: 1, 32>}, {transform_indices = @transform_4, window_bounds = array<i64: 8, 32>}]} {
    %c0_i32 = arith.constant 0 : i32
    %0 = arith.cmpi eq, %arg1, %c0_i32 : i32
    %1 = arith.extui %0 : i1 to i32
    %c0_i32_0 = arith.constant 0 : i32
    %2 = arith.cmpi ne, %1, %c0_i32_0 : i32
    scf.if %2 {
      %cst_21 = arith.constant 0.000000e+00 : f32
      %42 = vector.broadcast %cst_21 : f32 to vector<8x32xf32>
      %c0_22 = arith.constant 0 : index
      %c0_23 = arith.constant 0 : index
      %43 = vector.load %arg6[%c0_22, %c0_23] : memref<8x32xf32, #tpu.memory_space<vmem>>, vector<8x32xf32>
      tpu.vector_store %arg6[%c0_22, %c0_23], %42 {strides = array<i32>} : memref<8x32xf32, #tpu.memory_space<vmem>>, vector<8x32xf32>,
    } else {
    }
    %c0 = arith.constant 0 : index
    %c0_1 = arith.constant 0 : index
    %3 = vector.load %arg2[%c0, %c0_1] : memref<8x32xf32, #tpu.memory_space<vmem>>, vector<8x32xf32>
    %c0_2 = arith.constant 0 : index
    %c0_3 = arith.constant 0 : index
    %4 = vector.load %arg4[%c0_2, %c0_3] : memref<32x32xf32, #tpu.memory_space<vmem>>, vector<32x32xf32>
    %cst = arith.constant dense<0.000000e+00> : vector<8x32xf32>
    %5 = tpu.matmul %3, %4, %cst {dimension_numbers = #tpu.dot_dimension_numbers<[1], [0], [0], [1], [0, 0, 1, 1], [], []>} : vector<8x32xf32>, vector<32x32xf32>, vector<8x32xf32> -> vector<8x32xf32>
    %c0_4 = arith.constant 0 : index
    %c0_5 = arith.constant 0 : index
    %6 = vector.load %arg5[%c0_4, %c0_5] : memref<1x32xf32, #tpu.memory_space<vmem>>, vector<1x32xf32>
    %7 = vector.broadcast %6 : vector<1x32xf32> to vector<8x32xf32>
    %8 = arith.addf %5, %7 : vector<8x32xf32>
    %c8_i32 = arith.constant 8 : i32
    %9 = arith.muli %arg1, %c8_i32 : i32
    %10 = tpu.iota {dimensions = array<i32: 0>} : vector<8x1xi32>
    %11 = vector.broadcast %9 : i32 to vector<8x1xi32>
    %12 = arith.addi %11, %10 : vector<8x1xi32>
    %c8_i32_6 = arith.constant 8 : i32
    %13 = vector.broadcast %c8_i32_6 : i32 to vector<8x1xi32>
    %14 = arith.cmpi slt, %12, %13 : vector<8x1xi32>
    %cst_7 = arith.constant 0.000000e+00 : f32
    %15 = vector.shape_cast %14 : vector<8x1xi1> to vector<8x1xi1>
    %16 = vector.broadcast %15 : vector<8x1xi1> to vector<8x32xi1>
    %17 = vector.broadcast %cst_7 : f32 to vector<8x32xf32>
    %18 = arith.select %16, %8, %17 : vector<8x32xi1>, vector<8x32xf32>
    %cst_8 = arith.constant 0.000000e+00 : f32
    %19 = vector.broadcast %cst_8 : f32 to vector<8x32xf32>
    %20 = arith.cmpf ogt, %18, %19 : vector<8x32xf32>
    %21 = math.exp %18 : vector<8x32xf32>
    %cst_9 = arith.constant 1.000000e+00 : f32
    %22 = vector.broadcast %cst_9 : f32 to vector<8x32xf32>
    %23 = arith.subf %21, %22 : vector<8x32xf32>
    %cst_10 = arith.constant 1.67326319 : f32
    %24 = vector.broadcast %cst_10 : f32 to vector<8x32xf32>
    %25 = arith.mulf %24, %23 : vector<8x32xf32>
    %26 = arith.select %20, %18, %25 : vector<8x32xi1>, vector<8x32xf32>
    %cst_11 = arith.constant 1.05070102 : f32
    %27 = vector.broadcast %cst_11 : f32 to vector<8x32xf32>
    %28 = arith.mulf %27, %26 : vector<8x32xf32>
    %c0_12 = arith.constant 0 : index
    %c0_13 = arith.constant 0 : index
    %29 = vector.load %arg3[%c0_12, %c0_13] : memref<1x8xi32, #tpu.memory_space<vmem>>, vector<1x8xi32>
    %30 = tpu.iota {dimensions = array<i32: 0>} : vector<8x8xi32>
    %31 = vector.broadcast %29 : vector<1x8xi32> to vector<8x8xi32>
    %32 = arith.cmpi eq, %30, %31 : vector<8x8xi32>
    %33 = arith.extui %32 : vector<8x8xi1> to vector<8x8xi32>
    %34 = arith.sitofp %33 : vector<8x8xi32> to vector<8x8xf32>
    %c0_14 = arith.constant 0 : index
    %c0_15 = arith.constant 0 : index
    %35 = vector.load %arg6[%c0_14, %c0_15] : memref<8x32xf32, #tpu.memory_space<vmem>>, vector<8x32xf32>
    %cst_16 = arith.constant dense<0.000000e+00> : vector<8x32xf32>
    %36 = tpu.matmul %34, %28, %cst_16 {dimension_numbers = #tpu.dot_dimension_numbers<[1], [0], [0], [1], [0, 0, 1, 1], [], []>} : vector<8x8xf32>, vector<8x32xf32>, vector<8x32xf32> -> vector<8x32xf32>
    %37 = arith.addf %35, %36 : vector<8x32xf32>
    %c0_17 = arith.constant 0 : index
    %c0_18 = arith.constant 0 : index
    %38 = vector.load %arg6[%c0_17, %c0_18] : memref<8x32xf32, #tpu.memory_space<vmem>>, vector<8x32xf32>
    tpu.vector_store %arg6[%c0_17, %c0_18], %37 {strides = array<i32>} : memref<8x32xf32, #tpu.memory_space<vmem>>, vector<8x32xf32>,
    %c0_i32_19 = arith.constant 0 : i32
    %39 = arith.cmpi eq, %arg1, %c0_i32_19 : i32
    %40 = arith.extui %39 : i1 to i32
    %c0_i32_20 = arith.constant 0 : i32
    %41 = arith.cmpi ne, %40, %c0_i32_20 : i32
    scf.if %41 {
      %c0_21 = arith.constant 0 : index
      %c0_22 = arith.constant 0 : index
      %42 = vector.load %arg6[%c0_21, %c0_22] : memref<8x32xf32, #tpu.memory_space<vmem>>, vector<8x32xf32>
      %43 = math.tanh %42 : vector<8x32xf32>
      %c0_23 = arith.constant 0 : index
      %c0_24 = arith.constant 0 : index
      %44 = vector.load %arg6[%c0_23, %c0_24] : memref<8x32xf32, #tpu.memory_space<vmem>>, vector<8x32xf32>
      tpu.vector_store %arg6[%c0_23, %c0_24], %43 {strides = array<i32>} : memref<8x32xf32, #tpu.memory_space<vmem>>, vector<8x32xf32>,
    } else {
    }
    return
  }
  func.func @transform_0(%arg0: i32, %arg1: i32) -> (i32, i32) {
    %c0_i32 = arith.constant 0 : i32
    %c0_i32_0 = arith.constant 0 : i32
    return %arg1, %c0_i32 : i32, i32
  }
  func.func @transform_1(%arg0: i32, %arg1: i32) -> (i32, i32) {
    %c0_i32 = arith.constant 0 : i32
    %c0_i32_0 = arith.constant 0 : i32
    return %c0_i32, %arg1 : i32, i32
  }
  func.func @transform_2(%arg0: i32, %arg1: i32) -> (i32, i32) {
    %c0_i32 = arith.constant 0 : i32
    %c0_i32_0 = arith.constant 0 : i32
    return %c0_i32, %arg0 : i32, i32
  }
  func.func @transform_3(%arg0: i32, %arg1: i32) -> (i32, i32) {
    %c0_i32 = arith.constant 0 : i32
    %c0_i32_0 = arith.constant 0 : i32
    return %c0_i32, %arg0 : i32, i32
  }
  func.func @transform_4(%arg0: i32, %arg1: i32) -> (i32, i32) {
    %c0_i32 = arith.constant 0 : i32
    %c0_i32_0 = arith.constant 0 : i32
    return %c0_i32, %arg0 : i32, i32
  }
}

</mosaic_0001>

<bundles_post_ra>
// kernel: tpu_custom_call.1
= control target key start
LH: loop header
LB: loop body
LE: loop exit
PB: predicated region body
PF: predicated region fallthrough
CT: control target
= control target key end

     0   :  { %9 = vsyncpa [#allocation3], 0  ;;  %s342_s0 = inlined_call_operand.hbm [shape: f32[8,32], index: 0, kind: input, shape index: {}]   ;;  %s343_s1 = inlined_call_operand.hbm [shape: s32[1,8], index: 1, kind: input, shape index: {}]   ;;  %s344_s2 = inlined_call_operand.hbm [shape: f32[32,32], index: 2, kind: input, shape index: {}]   ;;  %s345_s3 = inlined_call_operand.vmem [shape: f32[1,32], index: 3, kind: input, shape index: {}]   ;;  %s346_s4 = inlined_call_operand.hbm [shape: f32[8,32], index: 4, kind: output, shape index: {}]  }
   0x1   :  { %10 = vsyncpa [#allocation6], 0  ;;  %s28_s17 = sshll.u32 %s343_s1, 4  ;;  %s29_s17 = int_to_ptr.hbm [resolvable:$true] %s28_s17 }
   0x2   :  { %11 = vsyncpa [#allocation4], 0  ;;  %s291_s18 = smov [#allocation5]   ;;  %s17_s22 = sshll.u32 %s342_s0, 4  ;;  %s18_s22 = int_to_ptr.hbm [resolvable:$true] %s17_s22 }
   0x3   :  { %s30_s19 = sshll.u32 %s291_s18, 4  ;;  %s292_s23 = smov [#allocation2]   ;;  %s31_s19 = int_to_ptr.vmem [resolvable:$true] %s30_s19 }
   0x4   :  { %33 = dma.hbm_to_vmem [thread:$0]  %s29_s17, 16, %s31_s19, [#allocation6]  }
   0x5   :  { %s19_s24 = sshll.u32 %s292_s23, 4  ;;  %s38_s27 = sshll.u32 %s344_s2, 4  ;;  %s20_s24 = int_to_ptr.vmem [resolvable:$true] %s19_s24  ;;  %s39_s27 = int_to_ptr.hbm [resolvable:$true] %s38_s27 }
   0x6   :  { %22 = dma.hbm_to_vmem [thread:$0]  %s18_s22, 128, %s20_s24, [#allocation3]  }
   0x7   :  { %s293_s1 = smov [#allocation7]   ;;  %s294_s29 = smov 128  }
   0x8   :  { %s40_s28 = sshll.u32 %s293_s1, 4  ;;  %s295_s30 = smov 8   ;;  %s41_s28 = int_to_ptr.vmem [resolvable:$true] %s40_s28 }
   0x9   :  { %46 = dma.hbm_to_vmem [thread:$0]  %s39_s27, 512, %s41_s28, [#allocation6], %s294_s29, %s294_s29, %s295_s30  }
   0xa   :  { %285 = dma.done.wait [#allocation3], 128  }
   0xb   :  { %286 = vsyncadd [#allocation3], 4294967168 }
   0xc   :  { %287 = dma.done.wait [#allocation6], 528  }
   0xd   :  { %288 = vsyncadd [#allocation6], 4294966768  ;;  %v71_v0 = vld [vmem:[#allocation7 + $0x18] sm:$0xff]  ;;  %v70_v1 = vld [vmem:[#allocation7 + $0x10] sm:$0xff]  ;;  %vm65_vm0 = vcmask 261120   ;;  %v296_v5 = vmov 0.0   ;;  %v101_v10 = vlaneseq }
   0xe   :  { %92 = vmatpush.msra.mxu0 %v71_v0  ;;  %v69_v2 = vld [vmem:[#allocation7 + $0x8] sm:$0xff]  ;;  %v68_v3 = vld [vmem:[#allocation7] sm:$0xff]  ;;  %v67_v4 = vld [vmem:[#allocation2] sm:$0xff]  ;;  %66 = vst.msk [vmem:[#allocation8] sm:$0xff] %vm65_vm0, %v296_v5  ;;  %vm122_vm3 = vcmask 64512   ;;  %s161_s8 = sshll.u32 %s346_s4, 4  ;;  %s162_s8 = int_to_ptr.hbm [resolvable:$true] %s161_s8 }
   0xf   :  { %v183_v6 = vld [vmem:[%s345_s3] ss:$0 sm:$0xff]  ;;  %v102_v11 = vshrl.u32 %v101_v10, 7  ;;  %v184_v12 = vld [vmem:[#allocation5] ss:$0 sm:$0xff]  ;;  %s297_s3 = smov [#allocation8]  }
  0x10   :  { %93 = vmatpush.msra.mxu0 %v70_v1  ;;  %s159_s5 = sshll.u32 %s297_s3, 4  ;;  %s160_s5 = int_to_ptr.vmem [resolvable:$true] %s159_s5 }
  0x11   :  { %vm118_vm1 = vcmp.eq.s32.totalorder %v102_v11, %v184_v12 }
  0x12   :  { %94 = vmatpush.msra.mxu0 %v69_v2  ;;  %v174_v18 = vsel %vm118_vm1, 1.0, %v296_v5 }
  0x14   :  { %95 = vmatpush.msra.mxu0 %v68_v3 }
  0x15   :  { %172 = vmatmul.msk.f32.vlgmr.msra.gmra.mxu0 %vm65_vm0, %v67_v4  ;;  %v121_v19 = vld [vmem:[#allocation8] sm:$0xff] }
  0x92   :  { %v97_v7 = vpop.f32.mrf.mxu0 }
  0x93   :  { %v98_v8 = vadd.f32 %v183_v6, %v97_v7 }
  0x95   :  { %v110_v9 = vmul.f32 1.442695, %v98_v8  ;;  %vm109_vm2 = vcmp.gt.f32.partialorder %v98_v8, 0.0 }
  0x97   :  { %185 = vpow2.f32 %v110_v9 }
  0x9d   :  { %v186_v13 = vpop.eup %185 }
  0x9e   :  { %v173_v14 = vadd.f32 -1.0, %v186_v13 }
  0xa0   :  { %v113_v15 = vmul.f32 1.6732632, %v173_v14 }
  0xa2   :  { %v114_v16 = vsel %vm109_vm2, %v98_v8, %v113_v15 }
  0xa3   :  { %v115_v17 = vmul.f32 1.050701, %v114_v16 }
  0xa5   :  { %141 = vmatpush.msra.mxu1 %v115_v17 }
  0xa6   :  { %175 = vmatmul.msk.f32.vlgmr.msra.gmra.mxu1 %vm122_vm3, %v174_v18 }
 0x123   :  { %v143_v20 = vpop.f32.mrf.mxu1 }
 0x124   :  { %v146_v21 = vadd.f32 %v143_v20, %v121_v19 }
 0x126   :  { %147 = vst.msk [vmem:[#allocation8] sm:$0xff] %vm65_vm0, %v146_v21 }
 0x12d   :  { %v151_v22 = vld [vmem:[#allocation8] sm:$0xff] }
 0x12e   :  { %187 = vtanh.f32 %v151_v22 }
 0x134   :  { %v188_v23 = vpop.eup %187 }
 0x135   :  { %153 = vst.msk [vmem:[#allocation8] sm:$0xff] %vm65_vm0, %v188_v23 }
 0x136   :  { %164 = dma.vmem_to_hbm [thread:$0]  %s160_s5, 128, %s162_s8, [#allocation4]  }
 0x137   :  { %289 = dma.done.wait [#allocation4], 128  }
 0x138   :  { %290 = vsyncadd [#allocation4], 4294967168 }
 0x139   :  { %169 = vsyncpa [#allocation3], 1 }
 0x13a   :  { %170 = vsyncpa [#allocation6], 1 }
 0x13b   :  { %171 = vsyncpa [#allocation4], 1 }

// kernel: tpu_custom_call.1
= control target key start
LH: loop header
LB: loop body
LE: loop exit
PB: predicated region body
PF: predicated region fallthrough
CT: control target
= control target key end

     0   :  { %9 = vsyncpa [#allocation3], 0  ;;  %s342_s0 = inlined_call_operand.hbm [shape: f32[8,32], index: 0, kind: input, shape index: {}]   ;;  %s343_s1 = inlined_call_operand.hbm [shape: s32[1,8], index: 1, kind: input, shape index: {}]   ;;  %s344_s2 = inlined_call_operand.hbm [shape: f32[32,32], index: 2, kind: input, shape index: {}]   ;;  %s345_s3 = inlined_call_operand.vmem [shape: f32[1,32], index: 3, kind: input, shape index: {}]   ;;  %s346_s4 = inlined_call_operand.hbm [shape: f32[8,32], index: 4, kind: output, shape index: {}]  }
   0x1   :  { %10 = vsyncpa [#allocation6], 0  ;;  %s28_s17 = sshll.u32 %s343_s1, 4  ;;  %s29_s17 = int_to_ptr.hbm [resolvable:$true] %s28_s17 }
   0x2   :  { %11 = vsyncpa [#allocation4], 0  ;;  %s291_s18 = smov [#allocation5]   ;;  %s17_s22 = sshll.u32 %s342_s0, 4  ;;  %s18_s22 = int_to_ptr.hbm [resolvable:$true] %s17_s22 }
   0x3   :  { %s30_s19 = sshll.u32 %s291_s18, 4  ;;  %s292_s23 = smov [#allocation2]   ;;  %s31_s19 = int_to_ptr.vmem [resolvable:$true] %s30_s19 }
   0x4   :  { %33 = dma.hbm_to_vmem [thread:$0]  %s29_s17, 16, %s31_s19, [#allocation6]  }
   0x5   :  { %s19_s24 = sshll.u32 %s292_s23, 4  ;;  %s38_s27 = sshll.u32 %s344_s2, 4  ;;  %s20_s24 = int_to_ptr.vmem [resolvable:$true] %s19_s24  ;;  %s39_s27 = int_to_ptr.hbm [resolvable:$true] %s38_s27 }
   0x6   :  { %22 = dma.hbm_to_vmem [thread:$0]  %s18_s22, 128, %s20_s24, [#allocation3]  }
   0x7   :  { %s293_s1 = smov [#allocation7]   ;;  %s294_s29 = smov 128  }
   0x8   :  { %s40_s28 = sshll.u32 %s293_s1, 4  ;;  %s295_s30 = smov 8   ;;  %s41_s28 = int_to_ptr.vmem [resolvable:$true] %s40_s28 }
   0x9   :  { %46 = dma.hbm_to_vmem [thread:$0]  %s39_s27, 512, %s41_s28, [#allocation6], %s294_s29, %s294_s29, %s295_s30  }
   0xa   :  { %285 = dma.done.wait [#allocation3], 128  }
   0xb   :  { %286 = vsyncadd [#allocation3], 4294967168 }
   0xc   :  { %287 = dma.done.wait [#allocation6], 528  }
   0xd   :  { %288 = vsyncadd [#allocation6], 4294966768  ;;  %v71_v0 = vld [vmem:[#allocation7 + $0x18] sm:$0xff]  ;;  %v70_v1 = vld [vmem:[#allocation7 + $0x10] sm:$0xff]  ;;  %vm65_vm0 = vcmask 261120   ;;  %v296_v5 = vmov 0.0   ;;  %v101_v10 = vlaneseq }
   0xe   :  { %92 = vmatpush.msra.mxu0 %v71_v0  ;;  %v69_v2 = vld [vmem:[#allocation7 + $0x8] sm:$0xff]  ;;  %v68_v3 = vld [vmem:[#allocation7] sm:$0xff]  ;;  %v67_v4 = vld [vmem:[#allocation2] sm:$0xff]  ;;  %66 = vst.msk [vmem:[#allocation8] sm:$0xff] %vm65_vm0, %v296_v5  ;;  %vm122_vm3 = vcmask 64512   ;;  %s161_s8 = sshll.u32 %s346_s4, 4  ;;  %s162_s8 = int_to_ptr.hbm [resolvable:$true] %s161_s8 }
   0xf   :  { %v183_v6 = vld [vmem:[%s345_s3] ss:$0 sm:$0xff]  ;;  %v102_v11 = vshrl.u32 %v101_v10, 7  ;;  %v184_v12 = vld [vmem:[#allocation5] ss:$0 sm:$0xff]  ;;  %s297_s3 = smov [#allocation8]  }
  0x10   :  { %93 = vmatpush.msra.mxu0 %v70_v1  ;;  %s159_s5 = sshll.u32 %s297_s3, 4  ;;  %s160_s5 = int_to_ptr.vmem [resolvable:$true] %s159_s5 }
  0x11   :  { %vm118_vm1 = vcmp.eq.s32.totalorder %v102_v11, %v184_v12 }
  0x12   :  { %94 = vmatpush.msra.mxu0 %v69_v2  ;;  %v174_v18 = vsel %vm118_vm1, 1.0, %v296_v5 }
  0x14   :  { %95 = vmatpush.msra.mxu0 %v68_v3 }
  0x15   :  { %172 = vmatmul.msk.f32.vlgmr.msra.gmra.mxu0 %vm65_vm0, %v67_v4  ;;  %v121_v19 = vld [vmem:[#allocation8] sm:$0xff] }
  0x92   :  { %v97_v7 = vpop.f32.mrf.mxu0 }
  0x93   :  { %v98_v8 = vadd.f32 %v183_v6, %v97_v7 }
  0x95   :  { %v110_v9 = vmul.f32 1.442695, %v98_v8  ;;  %vm109_vm2 = vcmp.gt.f32.partialorder %v98_v8, 0.0 }
  0x97   :  { %185 = vpow2.f32 %v110_v9 }
  0x9d   :  { %v186_v13 = vpop.eup %185 }
  0x9e   :  { %v173_v14 = vadd.f32 -1.0, %v186_v13 }
  0xa0   :  { %v113_v15 = vmul.f32 1.6732632, %v173_v14 }
  0xa2   :  { %v114_v16 = vsel %vm109_vm2, %v98_v8, %v113_v15 }
  0xa3   :  { %v115_v17 = vmul.f32 1.050701, %v114_v16 }
  0xa5   :  { %141 = vmatpush.msra.mxu1 %v115_v17 }
  0xa6   :  { %175 = vmatmul.msk.f32.vlgmr.msra.gmra.mxu1 %vm122_vm3, %v174_v18 }
 0x123   :  { %v143_v20 = vpop.f32.mrf.mxu1 }
 0x124   :  { %v146_v21 = vadd.f32 %v143_v20, %v121_v19 }
 0x126   :  { %147 = vst.msk [vmem:[#allocation8] sm:$0xff] %vm65_vm0, %v146_v21 }
 0x12d   :  { %v151_v22 = vld [vmem:[#allocation8] sm:$0xff] }
 0x12e   :  { %187 = vtanh.f32 %v151_v22 }
 0x134   :  { %v188_v23 = vpop.eup %187 }
 0x135   :  { %153 = vst.msk [vmem:[#allocation8] sm:$0xff] %vm65_vm0, %v188_v23 }
 0x136   :  { %164 = dma.vmem_to_hbm [thread:$0]  %s160_s5, 128, %s162_s8, [#allocation4]  }
 0x137   :  { %289 = dma.done.wait [#allocation4], 128  }
 0x138   :  { %290 = vsyncadd [#allocation4], 4294967168 }
 0x139   :  { %169 = vsyncpa [#allocation3], 1 }
 0x13a   :  { %170 = vsyncpa [#allocation6], 1 }
 0x13b   :  { %171 = vsyncpa [#allocation4], 1 }

</bundles_post_ra>
